<compile_context>
chip_gen: v7x
topology: tpu7x:2x2x1
jax: 0.10.0
libtpu: 0.0.40
codegen_flags: <defaults>
</compile_context>

<pallas_src>
import jax
import jax.numpy as jnp
from jax.experimental import pallas as pl
from jax.experimental.pallas import tpu as pltpu


def _round_up(x, m):
    return ((x + m - 1) // m) * m


def _residual_linear_kernel(x_ref, w_ref, b_ref, o_ref):
    # x_ref: (TM, D) input dtype   w_ref: (D, D) bf16   b_ref: (1, D) f32
    # o_ref: (TM, D) input dtype
    x = x_ref[...]
    # Feed the MXU in bf16, accumulate in f32.
    y = jnp.dot(x.astype(jnp.bfloat16), w_ref[...],
                preferred_element_type=jnp.float32)
    # Single fused f32 add of bias + residual (pure VPU filler under the MXU
    # shadow), one cast on the way out.
    o_ref[...] = (y + b_ref[...] + x.astype(jnp.float32)).astype(o_ref.dtype)


def residual_add_linear(x, w, b, *, tm=256):
    """ResidualAdd(Linear(D, D)).forward:  out = x @ w + b + x  (fused).

    x: (B, N, D)   w: (D, D)   b: (D,)
    """
    B, N, D = x.shape
    M = B * N

    # Row tile: big enough to fill the MXU and amortize per-step overhead,
    # clipped (8-aligned) for tiny inputs so we don't pad 16 tokens to 256.
    tm_eff = min(tm, _round_up(M, 8))
    m_pad = _round_up(M, tm_eff)
    grid = m_pad // tm_eff

    x2 = x.reshape(M, D)
    if m_pad != M:                      # tail handling: pad instead of assert
        x2 = jnp.pad(x2, ((0, m_pad - M), (0, 0)))
    w_bf16 = w.astype(jnp.bfloat16)     # halves HBM traffic & resident VMEM for W
    b2 = b.astype(jnp.float32).reshape(1, D)

    # Explicit VMEM budget: 2x double-buffered x tile + 2x out tile +
    # 2x resident bf16 W + bias.  Kept under v7x's 64 MiB per-TC VMEM.
    # TODO(synk): for D > ~3K add a K/N tiling axis for W (f32 accumulator
    # scratch + "arbitrary" reduction axis) instead of a full (D, D) block.
    itemsize = x2.dtype.itemsize
    work_bytes = (2 * tm_eff * D * itemsize      # x tiles
                  + 2 * tm_eff * D * itemsize    # out tiles
                  + 2 * D * D * 2                # bf16 weight
                  + 2 * D * 4)                   # bias
    vmem_limit = int(min(max(2 * work_bytes, 8 << 20), 48 << 20))

    cost = pl.CostEstimate(
        flops=2 * M * D * D,
        transcendentals=0,
        bytes_accessed=2 * M * D * itemsize + D * D * 2 + D * 4,
    )

    out = pl.pallas_call(
        _residual_linear_kernel,
        out_shape=jax.ShapeDtypeStruct((m_pad, D), x.dtype),
        grid_spec=pltpu.PrefetchScalarGridSpec(
            num_scalar_prefetch=0,
            grid=(grid,),
            in_specs=[
                pl.BlockSpec((tm_eff, D), lambda i: (i, 0)),   # x row tile
                pl.BlockSpec((D, D), lambda i: (0, 0)),        # resident bf16 W
                pl.BlockSpec((1, D), lambda i: (0, 0)),        # resident bias
            ],
            out_specs=pl.BlockSpec((tm_eff, D), lambda i: (i, 0)),
        ),
        compiler_params=pltpu.CompilerParams(
            dimension_semantics=("parallel",),   # megacore-shardable on v7x
            vmem_limit_bytes=vmem_limit,
        ),
        cost_estimate=cost,
    )(x2, w_bf16, b2)

    return out[:M].reshape(B, N, D)


def residual_add_linear_ref_f32(x, w, b):
    # Pure-f32 reference of ResidualAdd(Linear(D, D)).forward(x).
    return jnp.einsum("bnd,de->bne", x, w) + b + x


def residual_add_linear_ref_bf16(x, w, b):
    # Reference matching the kernel's bf16-MXU / f32-accumulate numerics.
    B, N, D = x.shape
    y = jnp.dot(x.reshape(B * N, D).astype(jnp.bfloat16),
                w.astype(jnp.bfloat16),
                preferred_element_type=jnp.float32).reshape(B, N, D)
    return (y + b.astype(jnp.float32) + x.astype(jnp.float32)).astype(x.dtype)


if __name__ == "__main__":
    key = jax.random.PRNGKey(0)
    kx, kw, kb, kx2 = jax.random.split(key, 4)

    # Small ViT-like shapes: batch=2, seq=8, hidden=128.
    B, N, D = 2, 8, 128
    x = jax.random.normal(kx, (B, N, D), dtype=jnp.float32)
    w = jax.random.normal(kw, (D, D), dtype=jnp.float32) * (1.0 / D**0.5)
    b = jax.random.normal(kb, (D,), dtype=jnp.float32) * 0.02

    out = jax.block_until_ready(residual_add_linear(x, w, b))
    assert out.shape == x.shape and out.dtype == x.dtype
    # Tight check vs a reference with matching bf16-MXU numerics.
    assert jnp.allclose(out, residual_add_linear_ref_bf16(x, w, b),
                        atol=1e-5, rtol=1e-5)
    # Loose sanity check vs the full-f32 reference (bf16 matmul rounding).
    assert jnp.allclose(out, residual_add_linear_ref_f32(x, w, b),
                        atol=5e-2, rtol=5e-2)

    # Non-divisible token count (exercises the pad-and-slice tail path).
    B2, N2 = 3, 5                                  # M = 15, not 8-aligned
    x_odd = jax.random.normal(kx2, (B2, N2, D), dtype=jnp.float32)
    out_odd = jax.block_until_ready(residual_add_linear(x_odd, w, b))
    assert out_odd.shape == x_odd.shape
    assert jnp.allclose(out_odd, residual_add_linear_ref_bf16(x_odd, w, b),
                        atol=1e-5, rtol=1e-5)

    print("KERNEL_OK")
</pallas_src>

<mosaic_0001>
module attributes {stable_mosaic.version = 11 : i64} {
  func.func @_residual_linear_kernel(%arg0: i32, %arg1: memref<16x128xf32, #tpu.memory_space<vmem>>, %arg2: memref<128x128xbf16, #tpu.memory_space<vmem>>, %arg3: memref<1x128xf32, #tpu.memory_space<vmem>>, %arg4: memref<16x128xf32, #tpu.memory_space<vmem>>) attributes {dimension_semantics = [#tpu.dimension_semantics<parallel>], iteration_bounds = array<i64: 1>, scalar_prefetch = 0 : i64, scratch_operands = 0 : i64, tpu.core_type = #tpu.core_type<tc>, window_params = [{transform_indices = @transform_0, window_bounds = array<i64: 16, 128>}, {pipeline_mode = #tpu.pipeline_mode<synchronous>, transform_indices = @transform_1, window_bounds = array<i64: 128, 128>}, {pipeline_mode = #tpu.pipeline_mode<synchronous>, transform_indices = @transform_2, window_bounds = array<i64: 1, 128>}, {transform_indices = @transform_3, window_bounds = array<i64: 16, 128>}]} {
    %c0 = arith.constant 0 : index
    %c0_0 = arith.constant 0 : index
    %0 = vector.load %arg1[%c0, %c0_0] : memref<16x128xf32, #tpu.memory_space<vmem>>, vector<16x128xf32>
    %1 = arith.truncf %0 : vector<16x128xf32> to vector<16x128xbf16>
    %c0_1 = arith.constant 0 : index
    %c0_2 = arith.constant 0 : index
    %2 = vector.load %arg2[%c0_1, %c0_2] : memref<128x128xbf16, #tpu.memory_space<vmem>>, vector<128x128xbf16>
    %cst = arith.constant dense<0.000000e+00> : vector<16x128xf32>
    %3 = tpu.matmul %1, %2, %cst {dimension_numbers = #tpu.dot_dimension_numbers<[1], [0], [0], [1], [0, 0, 1, 1], [], []>} : vector<16x128xbf16>, vector<128x128xbf16>, vector<16x128xf32> -> vector<16x128xf32>
    %c0_3 = arith.constant 0 : index
    %c0_4 = arith.constant 0 : index
    %4 = vector.load %arg3[%c0_3, %c0_4] : memref<1x128xf32, #tpu.memory_space<vmem>>, vector<1x128xf32>
    %5 = vector.broadcast %4 : vector<1x128xf32> to vector<16x128xf32>
    %6 = arith.addf %3, %5 : vector<16x128xf32>
    %7 = arith.addf %6, %0 : vector<16x128xf32>
    %c0_5 = arith.constant 0 : index
    %c0_6 = arith.constant 0 : index
    %8 = vector.load %arg4[%c0_5, %c0_6] : memref<16x128xf32, #tpu.memory_space<vmem>>, vector<16x128xf32>
    tpu.vector_store %arg4[%c0_5, %c0_6], %7 {strides = array<i32>} : memref<16x128xf32, #tpu.memory_space<vmem>>, vector<16x128xf32>,
    return
  }
  func.func @transform_0(%arg0: i32) -> (i32, i32) {
    %c0_i32 = arith.constant 0 : i32
    %c0_i32_0 = arith.constant 0 : i32
    return %arg0, %c0_i32 : i32, i32
  }
  func.func @transform_1(%arg0: i32) -> (i32, i32) {
    %c0_i32 = arith.constant 0 : i32
    %c0_i32_0 = arith.constant 0 : i32
    %c0_i32_1 = arith.constant 0 : i32
    return %c0_i32, %c0_i32_0 : i32, i32
  }
  func.func @transform_2(%arg0: i32) -> (i32, i32) {
    %c0_i32 = arith.constant 0 : i32
    %c0_i32_0 = arith.constant 0 : i32
    %c0_i32_1 = arith.constant 0 : i32
    return %c0_i32, %c0_i32_0 : i32, i32
  }
  func.func @transform_3(%arg0: i32) -> (i32, i32) {
    %c0_i32 = arith.constant 0 : i32
    %c0_i32_0 = arith.constant 0 : i32
    return %arg0, %c0_i32 : i32, i32
  }
}

</mosaic_0001>

<bundles_post_ra>
// kernel: tpu_custom_call.1
= control target key start
LH: loop header
LB: loop body
LE: loop exit
PB: predicated region body
PF: predicated region fallthrough
CT: control target
= control target key end

     0   :  { %8 = vsyncpa [#allocation3], 0  ;;  %s382_s0 = inlined_call_operand.hbm [shape: f32[16,128], index: 0, kind: input, shape index: {}]   ;;  %s383_s1 = inlined_call_operand.hbm [shape: bf16[128,128], index: 1, kind: input, shape index: {}]   ;;  %s384_s2 = inlined_call_operand.vmem [shape: f32[1,128], index: 2, kind: input, shape index: {}]   ;;  %s385_s3 = inlined_call_operand.hbm [shape: f32[16,128], index: 3, kind: output, shape index: {}]  }
   0x1   :  { %9 = vsyncpa [#allocation6], 0 }
   0x2   :  { %10 = vsyncpa [#allocation4], 0  ;;  %s308_s12 = smov [#allocation2]   ;;  %s236_s16 = scalar_lea.hbm %s382_s0, 256 }
   0x3   :  { %s16_s13 = sshll.u32 %s308_s12, 4  ;;  %p237_p0 = scmp.ne.s32.totalorder %s382_s0, %s236_s16  ;;  %s17_s13 = int_to_ptr.vmem [resolvable:$true] %s16_s13 }
   0x4   :  { %p240_p1 = scmp.lt.u32.totalorder %s236_s16, %s382_s0 }
   0x6   :  { %p242_p2 = pnand %p240_p1, %p237_p0 }
   0x8   :  { %245 = shalt.err (!%p242_p2)
}
   0x9   :  { %s246_s21 = scalar_lea.vmem %s17_s13, 256  ;;  %p251_p4 = scmp.lt.s32.totalorder %s17_s13, %s17_s13 }
   0xa   :  { %p247_p3 = scmp.ne.s32.totalorder %s17_s13, %s246_s21  ;;  %p252_p5 = scmp.lt.s32.totalorder %s246_s21, %s246_s21 }
   0xc   :  { %p253_p6 = por %p252_p5, %p251_p4 }
   0xe   :  { %p254_p7 = pnand %p253_p6, %p247_p3 }
  0x10   :  { %257 = shalt.err (!%p254_p7)
}
  0x11   :  { %s309_s22 = smov 128   ;;  %s310_s23 = smov 8  }
  0x12   :  { %22 = dma.hbm_to_vmem [thread:$0]  %s382_s0, 256, %s17_s13, [#allocation3], %s309_s22, %s309_s22, %s310_s23  }
  0x13   :  { %s311_s26 = smov [#allocation5]   ;;  %s258_s30 = scalar_lea.hbm %s383_s1, 1024 }
  0x14   :  { %s28_s27 = sshll.u32 %s311_s26, 4  ;;  %p259_p8 = scmp.ne.s32.totalorder %s383_s1, %s258_s30  ;;  %s29_s27 = int_to_ptr.vmem [resolvable:$true] %s28_s27 }
  0x15   :  { %p262_p9 = scmp.lt.u32.totalorder %s258_s30, %s383_s1 }
  0x17   :  { %p264_p10 = pnand %p262_p9, %p259_p8 }
  0x19   :  { %267 = shalt.err (!%p264_p10)
}
  0x1a   :  { %s268_s8 = scalar_lea.vmem %s29_s27, 1024  ;;  %p273_p12 = scmp.lt.s32.totalorder %s29_s27, %s29_s27 }
  0x1b   :  { %p269_p11 = scmp.ne.s32.totalorder %s29_s27, %s268_s8  ;;  %p274_p13 = scmp.lt.s32.totalorder %s268_s8, %s268_s8 }
  0x1d   :  { %p275_p0 = por %p274_p13, %p273_p12 }
  0x1f   :  { %p276_p1 = pnand %p275_p0, %p269_p11 }
  0x21   :  { %279 = shalt.err (!%p276_p1)
}
  0x22   :  { %s312_s0 = smov 64   ;;  %s313_s9 = smov 4  }
  0x23   :  { %34 = dma.hbm_to_vmem [thread:$0]  %s383_s1, 1024, %s29_s27, [#allocation6], %s312_s0, %s312_s0, %s313_s9  }
  0x24   :  { %302 = dma.done.wait [#allocation3], 256  }
  0x25   :  { %303 = vsyncadd [#allocation3], 4294967040 }
  0x26   :  { %304 = dma.done.wait [#allocation6], 1024  }
  0x27   :  { %305 = vsyncadd [#allocation6], 4294966272  ;;  %v314_v0 = vmov 0.0   ;;  %vm315_vm0 = vmmov 0   ;;  %v228_v1 = vld [vmem:[#allocation5] sm:$0xff]   ;;  %v229_v2 = vld [vmem:[#allocation5 + $0x8] sm:$0xff]  }
  0x28   :  { %199 = vmatprep.subr.bf16.mxu0 %v314_v0  ;;  %215 = vmatprep.mubr.msk.bf16.mxu0 %vm315_vm0, %v314_v0  ;;  %v230_v3 = vld [vmem:[#allocation5 + $0x10] sm:$0xff]   ;;  %v231_v4 = vld [vmem:[#allocation5 + $0x18] sm:$0xff]   ;;  %v232_v5 = vld [vmem:[#allocation5 + $0x20] sm:$0xff]   ;;  %s316_s13 = smov [#allocation7]  }
  0x29   :  { %200 = vmatpush3.bf16.msra.mxu0 %v228_v1  ;;  %v233_v6 = vld [vmem:[#allocation5 + $0x28] sm:$0xff]   ;;  %v234_v7 = vld [vmem:[#allocation5 + $0x30] sm:$0xff]   ;;  %v235_v8 = vld [vmem:[#allocation5 + $0x38] sm:$0xff]   ;;  %s168_s14 = sshll.u32 %s316_s13, 4  ;;  %s169_s14 = int_to_ptr.vmem [resolvable:$true] %s168_s14 }
  0x2a   :  { %201 = vmatprep.subr.bf16.mxu0 %v314_v0  ;;  %v44_v9 = vld [vmem:[#allocation2] sm:$0xff]  ;;  %v45_v10 = vld [vmem:[#allocation2 + $0x8] sm:$0xff]  ;;  %s280_s15 = scalar_lea.vmem %s169_s14, 256  ;;  %p285_p3 = scmp.lt.s32.totalorder %s169_s14, %s169_s14 }
  0x2b   :  { %v46_v11 = vpack.c.bf16 %v45_v10, %v44_v9  ;;  %v181_v12 = vld [vmem:[%s384_s2] ss:$0 sm:$0xff]  ;;  %p281_p2 = scmp.ne.s32.totalorder %s169_s14, %s280_s15  ;;  %p286_p4 = scmp.lt.s32.totalorder %s280_s15, %s280_s15 }
  0x2d   :  { %202 = vmatpush3.bf16.msra.mxu0 %v229_v2  ;;  %p287_p5 = por %p286_p4, %p285_p3 }
  0x2e   :  { %203 = vmatprep.subr.bf16.mxu0 %v314_v0 }
  0x2f   :  { %p288_p6 = pnand %p287_p5, %p281_p2 }
  0x31   :  { %204 = vmatpush3.bf16.msra.mxu0 %v230_v3 }
  0x32   :  { %205 = vmatprep.subr.bf16.mxu0 %v314_v0 }
  0x35   :  { %206 = vmatpush3.bf16.msra.mxu0 %v231_v4 }
  0x36   :  { %207 = vmatprep.subr.bf16.mxu0 %v314_v0 }
  0x39   :  { %208 = vmatpush3.bf16.msra.mxu0 %v232_v5 }
  0x3a   :  { %209 = vmatprep.subr.bf16.mxu0 %v314_v0 }
  0x3d   :  { %210 = vmatpush3.bf16.msra.mxu0 %v233_v6 }
  0x3e   :  { %211 = vmatprep.subr.bf16.mxu0 %v314_v0 }
  0x41   :  { %212 = vmatpush3.bf16.msra.mxu0 %v234_v7 }
  0x42   :  { %213 = vmatprep.subr.bf16.mxu0 %v314_v0 }
  0x45   :  { %214 = vmatpush3.bf16.msra.mxu0 %v235_v8 }
  0x48   :  { %216 = vmatmul.mubr.bf16.vlgmr.msra.gmra.mrb[0].mxu0 %v46_v11 }
 0x11b   :  { %v152_v13 = vpop.f32.mrb[0].mxu0 }
 0x11c   :  { %v153_v14 = vadd.f32 %v181_v12, %v152_v13  ;;  %v217_v15 = vpop.f32.mrb[1].mxu0 }
 0x11d   :  { %v155_v16 = vpop.f32.mrb[2].mxu0 }
 0x11e   :  { %v159_v17 = vadd.f32 %v153_v14, %v44_v9  ;;  %v156_v18 = vadd.f32 %v181_v12, %v155_v16  ;;  %v218_v19 = vpop.f32.mrb[3].mxu0 }
 0x120   :  { %161 = vst [vmem:[#allocation7] sm:$0xff] %v159_v17  ;;  %v160_v20 = vadd.f32 %v156_v18, %v45_v10 }
 0x122   :  { %162 = vst [vmem:[#allocation7 + $0x8] sm:$0xff] %v160_v20 }
 0x123   :  { %291 = shalt.err (!%p288_p6)
}
 0x124   :  { %s292_s17 = scalar_lea.hbm %s385_s3, 256 }
 0x125   :  { %p293_p7 = scmp.ne.s32.totalorder %s385_s3, %s292_s17  ;;  %p296_p8 = scmp.lt.u32.totalorder %s292_s17, %s385_s3 }
 0x127   :  { %p298_p9 = pnand %p296_p8, %p293_p7 }
 0x129   :  { %301 = shalt.err (!%p298_p9)
}
 0x12a   :  { %174 = dma.vmem_to_hbm [thread:$0]  %s169_s14, 256, %s385_s3, [#allocation4], %s309_s22, %s309_s22, %s310_s23  }
 0x12b   :  { %306 = dma.done.wait [#allocation4], 256  }
 0x12c   :  { %307 = vsyncadd [#allocation4], 4294967040 }
 0x12d   :  { %178 = vsyncpa [#allocation3], 1 }
 0x12e   :  { %179 = vsyncpa [#allocation6], 1 }
 0x12f   :  { %180 = vsyncpa [#allocation4], 1 }

</bundles_post_ra>
